<compile_context>
chip_gen: v6e
topology: v6e:2x2x1
jax: 0.10.0
libtpu: 0.0.40
codegen_flags: <defaults>
</compile_context>

<pallas_src>
import functools

import jax
import jax.numpy as jnp
from jax.experimental import pallas as pl
from jax.experimental.pallas import tpu as pltpu


def _round_up(x, m):
    return (x + m - 1) // m * m


_VMEM_LIMIT = 32 * 1024 * 1024  # explicit scoped-VMEM budget; safe on v5e/v6e/v7x


# ----------------------------- Pallas kernels ------------------------------ #

def conv_stats_kernel(p_ref, w_ref, y_ref, stats_ref):
    """Fused 3x3 conv (one K=9*Cin matmul) + per-tile BN partial statistics.

    p_ref:     (TILE_P, Kp)     bf16 im2col patches (zero-padded rows/cols)
    w_ref:     (Kp, Coutp)      bf16 packed conv weights
    y_ref:     (TILE_P, Coutp)  f32  pre-BN conv output for this tile
    stats_ref: (1, 2, Coutp)    f32  [sum, sum_of_squares] over this tile's rows
    """
    acc = jnp.dot(p_ref[...], w_ref[...], preferred_element_type=jnp.float32)
    y_ref[...] = acc
    # Per-tile partial BN statistics (f32).  Zero-padded rows contribute zero,
    # so the wrapper can divide by the true element count.
    stats_ref[0, 0:1, :] = jnp.sum(acc, axis=0, keepdims=True)
    stats_ref[0, 1:2, :] = jnp.sum(acc * acc, axis=0, keepdims=True)


def bn_relu_kernel(y_ref, scale_ref, shift_ref, o_ref):
    """out = relu(y * scale + shift)   (BN normalize + affine folded into scale/shift)."""
    o_ref[...] = jnp.maximum(
        y_ref[...] * scale_ref[...] + shift_ref[...], 0.0).astype(o_ref.dtype)


def bn_add_relu_kernel(y_ref, scale_ref, shift_ref, r_ref, o_ref):
    """out = relu(y * scale + shift + residual)."""
    o_ref[...] = jnp.maximum(
        y_ref[...] * scale_ref[...] + shift_ref[...] + r_ref[...], 0.0
    ).astype(o_ref.dtype)


# ------------------------------- JAX wrapper -------------------------------- #

def _im2col_3x3_bf16(x_nhwc, kp, pp):
    """3x3 / stride 1 / pad 1 patches -> (Pp, Kp) bf16, zero-padded."""
    n, h, w, c = x_nhwc.shape
    xb = x_nhwc.astype(jnp.bfloat16)
    xpad = jnp.pad(xb, ((0, 0), (1, 1), (1, 1), (0, 0)))
    cols = [xpad[:, kh:kh + h, kw:kw + w, :]
            for kh in range(3) for kw in range(3)]
    p = jnp.concatenate(cols, axis=-1).reshape(n * h * w, 9 * c)
    return jnp.pad(p, ((0, pp - n * h * w), (0, kp - 9 * c)))


def _pack_weights(w_hwio, kp, coutp):
    """(3,3,Cin,Cout) -> (Kp, Coutp) bf16, zero-padded, tap-major/channel-minor."""
    kh, kw, cin, cout = w_hwio.shape
    wm = w_hwio.reshape(kh * kw * cin, cout).astype(jnp.bfloat16)
    return jnp.pad(wm, ((0, kp - kh * kw * cin), (0, coutp - cout)))


def _conv_pass(patches, w_packed, tile_p):
    """Tiled conv matmul + per-tile BN partial stats."""
    pp, kp = patches.shape
    coutp = w_packed.shape[1]
    n_tiles = pp // tile_p
    y, stats = pl.pallas_call(
        conv_stats_kernel,
        grid=(n_tiles,),
        in_specs=[
            pl.BlockSpec((tile_p, kp), lambda i: (i, 0)),     # patch tile
            pl.BlockSpec((kp, coutp), lambda i: (0, 0)),      # weights (resident)
        ],
        out_specs=[
            pl.BlockSpec((tile_p, coutp), lambda i: (i, 0)),  # pre-BN conv out
            pl.BlockSpec((1, 2, coutp), lambda i: (i, 0, 0)),  # per-tile stats
        ],
        out_shape=[
            jax.ShapeDtypeStruct((pp, coutp), jnp.float32),
            jax.ShapeDtypeStruct((n_tiles, 2, coutp), jnp.float32),
        ],
        compiler_params=pltpu.CompilerParams(
            dimension_semantics=("parallel",),
            vmem_limit_bytes=_VMEM_LIMIT),
    )(patches, w_packed)
    return y, stats


def _bn_scale_shift(stats, gamma, beta, coutp, p_real, eps=1e-5):
    """Fold training-mode BN (batch stats) + affine into per-channel scale/shift."""
    tot = jnp.sum(stats, axis=0)                    # (2, Coutp) f32
    mean = tot[0] / p_real
    var = tot[1] / p_real - mean * mean             # biased variance
    g = jnp.pad(gamma.astype(jnp.float32), (0, coutp - gamma.shape[0]))
    b = jnp.pad(beta.astype(jnp.float32), (0, coutp - beta.shape[0]))
    scale = g * jax.lax.rsqrt(var + eps)
    shift = b - mean * scale
    return scale.reshape(1, coutp), shift.reshape(1, coutp)


def _bn_act_pass(y, scale, shift, residual, tile_p, out_dtype):
    """Tiled normalize + affine (+ residual) + ReLU."""
    pp, coutp = y.shape
    n_tiles = pp // tile_p
    row_spec = pl.BlockSpec((tile_p, coutp), lambda i: (i, 0))
    vec_spec = pl.BlockSpec((1, coutp), lambda i: (0, 0))
    if residual is None:
        kernel, in_specs, args = bn_relu_kernel, [row_spec, vec_spec, vec_spec], (y, scale, shift)
    else:
        kernel = bn_add_relu_kernel
        in_specs = [row_spec, vec_spec, vec_spec, row_spec]
        args = (y, scale, shift, residual)
    return pl.pallas_call(
        kernel,
        grid=(n_tiles,),
        in_specs=in_specs,
        out_specs=row_spec,
        out_shape=jax.ShapeDtypeStruct((pp, coutp), out_dtype),
        compiler_params=pltpu.CompilerParams(
            dimension_semantics=("parallel",),
            vmem_limit_bytes=_VMEM_LIMIT),
    )(*args)


def basic_block_forward(x_nchw, params, *, tile_p=1024):
    """BasicBlock.forward (stride=1, downsample=None, identity residual)."""
    x = jnp.transpose(x_nchw, (0, 2, 3, 1)).astype(jnp.float32)  # NCHW -> NHWC
    n, h, w, cin = x.shape
    cout = params["w1"].shape[-1]
    assert cin == cout, "identity residual requires in_channels == out_channels"

    p_real = n * h * w
    tile_p = _round_up(min(tile_p, _round_up(p_real, 8)), 8)
    pp = _round_up(p_real, tile_p)
    kp1 = _round_up(9 * cin, 128)
    kp2 = _round_up(9 * cout, 128)
    coutp = _round_up(cout, 128)

    # ---------------- conv1 -> bn1 -> relu ----------------
    patches1 = _im2col_3x3_bf16(x, kp1, pp)
    w1 = _pack_weights(params["w1"], kp1, coutp)
    y1, st1 = _conv_pass(patches1, w1, tile_p)
    sc1, sh1 = _bn_scale_shift(st1, params["g1"], params["b1"], coutp, p_real)
    act1 = _bn_act_pass(y1, sc1, sh1, None, tile_p, jnp.bfloat16)
    act1_nhwc = act1[:p_real, :cout].reshape(n, h, w, cout)

    # ---------------- conv2 -> bn2 -> +residual -> relu ----------------
    patches2 = _im2col_3x3_bf16(act1_nhwc, kp2, pp)
    w2 = _pack_weights(params["w2"], kp2, coutp)
    y2, st2 = _conv_pass(patches2, w2, tile_p)
    sc2, sh2 = _bn_scale_shift(st2, params["g2"], params["b2"], coutp, p_real)
    res = jnp.pad(x.reshape(p_real, cin),
                  ((0, pp - p_real), (0, coutp - cin)))
    out = _bn_act_pass(y2, sc2, sh2, res, tile_p, jnp.float32)

    out = out[:p_real, :cout].reshape(n, h, w, cout)
    return jnp.transpose(out, (0, 3, 1, 2))  # NHWC -> NCHW


# ------------------------------ pure-JAX reference -------------------------- #

def _ref_conv3x3(x, w):
    n, h, wd, _ = x.shape
    cout = w.shape[-1]
    xp = jnp.pad(x, ((0, 0), (1, 1), (1, 1), (0, 0)))
    out = jnp.zeros((n, h, wd, cout), jnp.float32)
    for kh in range(3):
        for kw in range(3):
            out = out + jnp.einsum(
                "nhwi,io->nhwo", xp[:, kh:kh + h, kw:kw + wd, :], w[kh, kw],
                preferred_element_type=jnp.float32)
    return out


def _ref_bn(y, g, b):
    m = jnp.mean(y, axis=(0, 1, 2), keepdims=True)
    v = jnp.mean((y - m) ** 2, axis=(0, 1, 2), keepdims=True)
    return (y - m) * jax.lax.rsqrt(v + 1e-5) * g + b


def ref_basic_block(x_nchw, params):
    x = jnp.transpose(x_nchw, (0, 2, 3, 1))
    out = jax.nn.relu(_ref_bn(_ref_conv3x3(x, params["w1"]),
                              params["g1"], params["b1"]))
    out = _ref_bn(_ref_conv3x3(out, params["w2"]), params["g2"], params["b2"]) + x
    out = jax.nn.relu(out)
    return jnp.transpose(out, (0, 3, 1, 2))


# ------------------------------------ main ---------------------------------- #

if __name__ == "__main__":
    key = jax.random.PRNGKey(0)
    N, C, H, W = 2, 4, 16, 16  # in_channels == out_channels (downsample=False)
    ks = jax.random.split(key, 7)

    x = jax.random.normal(ks[0], (N, C, H, W), jnp.float32)
    params = {
        # conv weights kept in HWIO (3, 3, Cin, Cout); PyTorch shape would be
        # (Cout, Cin, 3, 3) -- same parameter count, deterministic init here.
        "w1": 0.1 * jax.random.normal(ks[1], (3, 3, C, C), jnp.float32),
        "g1": 1.0 + 0.1 * jax.random.normal(ks[2], (C,), jnp.float32),
        "b1": 0.1 * jax.random.normal(ks[3], (C,), jnp.float32),
        "w2": 0.1 * jax.random.normal(ks[4], (3, 3, C, C), jnp.float32),
        "g2": 1.0 + 0.1 * jax.random.normal(ks[5], (C,), jnp.float32),
        "b2": 0.1 * jax.random.normal(ks[6], (C,), jnp.float32),
    }

    # Small tile_p so the multi-tile BN-stats accumulation path is exercised
    # even at this toy size (P = 512 -> grid of 4 tiles per pass).
    fwd = jax.jit(functools.partial(basic_block_forward, tile_p=128))
    out = jax.block_until_ready(fwd(x, params))

    ref = ref_basic_block(x, params)
    assert out.shape == (N, C, H, W), out.shape
    max_err = float(jnp.max(jnp.abs(out - ref)))
    # Matmul inputs are bf16 (f32 accumulation), so compare against the pure
    # f32 reference at bf16-level tolerance.
    assert jnp.allclose(out, ref, atol=3e-2, rtol=3e-2), max_err

    print("KERNEL_OK")
</pallas_src>

<mosaic_0001>
module attributes {stable_mosaic.version = 11 : i64} {
  func.func @conv_stats_kernel(%arg0: i32, %arg1: memref<128x128xbf16, #tpu.memory_space<vmem>>, %arg2: memref<128x128xbf16, #tpu.memory_space<vmem>>, %arg3: memref<128x128xf32, #tpu.memory_space<vmem>>, %arg4: memref<1x2x128xf32, #tpu.memory_space<vmem>>) attributes {dimension_semantics = [#tpu.dimension_semantics<parallel>], iteration_bounds = array<i64: 4>, scalar_prefetch = 0 : i64, scratch_operands = 0 : i64, tpu.core_type = #tpu.core_type<tc>, window_params = [{transform_indices = @transform_0, window_bounds = array<i64: 128, 128>}, {pipeline_mode = #tpu.pipeline_mode<synchronous>, transform_indices = @transform_1, window_bounds = array<i64: 128, 128>}, {transform_indices = @transform_2, window_bounds = array<i64: 128, 128>}, {transform_indices = @transform_3, window_bounds = array<i64: 1, 2, 128>}]} {
    %c0 = arith.constant 0 : index
    %c0_0 = arith.constant 0 : index
    %0 = vector.load %arg1[%c0, %c0_0] : memref<128x128xbf16, #tpu.memory_space<vmem>>, vector<128x128xbf16>
    %c0_1 = arith.constant 0 : index
    %c0_2 = arith.constant 0 : index
    %1 = vector.load %arg2[%c0_1, %c0_2] : memref<128x128xbf16, #tpu.memory_space<vmem>>, vector<128x128xbf16>
    %cst = arith.constant dense<0.000000e+00> : vector<128x128xf32>
    %2 = tpu.matmul %0, %1, %cst {dimension_numbers = #tpu.dot_dimension_numbers<[1], [0], [0], [1], [0, 0, 1, 1], [], []>} : vector<128x128xbf16>, vector<128x128xbf16>, vector<128x128xf32> -> vector<128x128xf32>
    %c0_3 = arith.constant 0 : index
    %c0_4 = arith.constant 0 : index
    %3 = vector.load %arg3[%c0_3, %c0_4] : memref<128x128xf32, #tpu.memory_space<vmem>>, vector<128x128xf32>
    tpu.vector_store %arg3[%c0_3, %c0_4], %2 {strides = array<i32>} : memref<128x128xf32, #tpu.memory_space<vmem>>, vector<128x128xf32>,
    %cst_5 = arith.constant dense<0.000000e+00> : vector<128xf32>
    %4 = vector.multi_reduction <add>, %2, %cst_5 [0] : vector<128x128xf32> to vector<128xf32>
    %5 = vector.shape_cast %4 : vector<128xf32> to vector<1x128xf32>
    %c0_6 = arith.constant 0 : index
    %c0_7 = arith.constant 0 : index
    %c0_8 = arith.constant 0 : index
    %6 = vector.load %arg4[%c0_6, %c0_7, %c0_8] : memref<1x2x128xf32, #tpu.memory_space<vmem>>, vector<1x1x128xf32>
    %7 = vector.shape_cast %6 : vector<1x1x128xf32> to vector<1x128xf32>
    %8 = vector.shape_cast %5 : vector<1x128xf32> to vector<1x1x128xf32>
    tpu.vector_store %arg4[%c0_6, %c0_7, %c0_8], %8 {strides = array<i32>} : memref<1x2x128xf32, #tpu.memory_space<vmem>>, vector<1x1x128xf32>,
    %9 = arith.mulf %2, %2 : vector<128x128xf32>
    %cst_9 = arith.constant dense<0.000000e+00> : vector<128xf32>
    %10 = vector.multi_reduction <add>, %9, %cst_9 [0] : vector<128x128xf32> to vector<128xf32>
    %11 = vector.shape_cast %10 : vector<128xf32> to vector<1x128xf32>
    %c0_10 = arith.constant 0 : index
    %c1 = arith.constant 1 : index
    %c0_11 = arith.constant 0 : index
    %12 = vector.load %arg4[%c0_10, %c1, %c0_11] : memref<1x2x128xf32, #tpu.memory_space<vmem>>, vector<1x1x128xf32>
    %13 = vector.shape_cast %12 : vector<1x1x128xf32> to vector<1x128xf32>
    %14 = vector.shape_cast %11 : vector<1x128xf32> to vector<1x1x128xf32>
    tpu.vector_store %arg4[%c0_10, %c1, %c0_11], %14 {strides = array<i32>} : memref<1x2x128xf32, #tpu.memory_space<vmem>>, vector<1x1x128xf32>,
    return
  }
  func.func @transform_0(%arg0: i32) -> (i32, i32) {
    %c0_i32 = arith.constant 0 : i32
    %c0_i32_0 = arith.constant 0 : i32
    return %arg0, %c0_i32 : i32, i32
  }
  func.func @transform_1(%arg0: i32) -> (i32, i32) {
    %c0_i32 = arith.constant 0 : i32
    %c0_i32_0 = arith.constant 0 : i32
    %c0_i32_1 = arith.constant 0 : i32
    return %c0_i32, %c0_i32_0 : i32, i32
  }
  func.func @transform_2(%arg0: i32) -> (i32, i32) {
    %c0_i32 = arith.constant 0 : i32
    %c0_i32_0 = arith.constant 0 : i32
    return %arg0, %c0_i32 : i32, i32
  }
  func.func @transform_3(%arg0: i32) -> (i32, i32, i32) {
    %c0_i32 = arith.constant 0 : i32
    %c0_i32_0 = arith.constant 0 : i32
    %c0_i32_1 = arith.constant 0 : i32
    return %arg0, %c0_i32, %c0_i32_0 : i32, i32, i32
  }
}

module attributes {stable_mosaic.version = 11 : i64} {
  func.func @bn_relu_kernel(%arg0: i32, %arg1: memref<128x128xf32, #tpu.memory_space<vmem>>, %arg2: memref<1x128xf32, #tpu.memory_space<vmem>>, %arg3: memref<1x128xf32, #tpu.memory_space<vmem>>, %arg4: memref<128x128xbf16, #tpu.memory_space<vmem>>) attributes {dimension_semantics = [#tpu.dimension_semantics<parallel>], iteration_bounds = array<i64: 4>, scalar_prefetch = 0 : i64, scratch_operands = 0 : i64, tpu.core_type = #tpu.core_type<tc>, window_params = [{transform_indices = @transform_0, window_bounds = array<i64: 128, 128>}, {pipeline_mode = #tpu.pipeline_mode<synchronous>, transform_indices = @transform_1, window_bounds = array<i64: 1, 128>}, {pipeline_mode = #tpu.pipeline_mode<synchronous>, transform_indices = @transform_2, window_bounds = array<i64: 1, 128>}, {transform_indices = @transform_3, window_bounds = array<i64: 128, 128>}]} {
    %c0 = arith.constant 0 : index
    %c0_0 = arith.constant 0 : index
    %0 = vector.load %arg1[%c0, %c0_0] : memref<128x128xf32, #tpu.memory_space<vmem>>, vector<128x128xf32>
    %c0_1 = arith.constant 0 : index
    %c0_2 = arith.constant 0 : index
    %1 = vector.load %arg2[%c0_1, %c0_2] : memref<1x128xf32, #tpu.memory_space<vmem>>, vector<1x128xf32>
    %2 = vector.broadcast %1 : vector<1x128xf32> to vector<128x128xf32>
    %3 = arith.mulf %0, %2 : vector<128x128xf32>
    %c0_3 = arith.constant 0 : index
    %c0_4 = arith.constant 0 : index
    %4 = vector.load %arg3[%c0_3, %c0_4] : memref<1x128xf32, #tpu.memory_space<vmem>>, vector<1x128xf32>
    %5 = vector.broadcast %4 : vector<1x128xf32> to vector<128x128xf32>
    %6 = arith.addf %3, %5 : vector<128x128xf32>
    %cst = arith.constant 0.000000e+00 : f32
    %7 = vector.broadcast %cst : f32 to vector<128x128xf32>
    %8 = arith.maximumf %6, %7 : vector<128x128xf32>
    %9 = arith.truncf %8 : vector<128x128xf32> to vector<128x128xbf16>
    %c0_5 = arith.constant 0 : index
    %c0_6 = arith.constant 0 : index
    %10 = vector.load %arg4[%c0_5, %c0_6] : memref<128x128xbf16, #tpu.memory_space<vmem>>, vector<128x128xbf16>
    tpu.vector_store %arg4[%c0_5, %c0_6], %9 {strides = array<i32>} : memref<128x128xbf16, #tpu.memory_space<vmem>>, vector<128x128xbf16>,
    return
  }
  func.func @transform_0(%arg0: i32) -> (i32, i32) {
    %c0_i32 = arith.constant 0 : i32
    %c0_i32_0 = arith.constant 0 : i32
    return %arg0, %c0_i32 : i32, i32
  }
  func.func @transform_1(%arg0: i32) -> (i32, i32) {
    %c0_i32 = arith.constant 0 : i32
    %c0_i32_0 = arith.constant 0 : i32
    %c0_i32_1 = arith.constant 0 : i32
    return %c0_i32, %c0_i32_0 : i32, i32
  }
  func.func @transform_2(%arg0: i32) -> (i32, i32) {
    %c0_i32 = arith.constant 0 : i32
    %c0_i32_0 = arith.constant 0 : i32
    %c0_i32_1 = arith.constant 0 : i32
    return %c0_i32, %c0_i32_0 : i32, i32
  }
  func.func @transform_3(%arg0: i32) -> (i32, i32) {
    %c0_i32 = arith.constant 0 : i32
    %c0_i32_0 = arith.constant 0 : i32
    return %arg0, %c0_i32 : i32, i32
  }
}

module attributes {stable_mosaic.version = 11 : i64} {
  func.func @bn_add_relu_kernel(%arg0: i32, %arg1: memref<128x128xf32, #tpu.memory_space<vmem>>, %arg2: memref<1x128xf32, #tpu.memory_space<vmem>>, %arg3: memref<1x128xf32, #tpu.memory_space<vmem>>, %arg4: memref<128x128xf32, #tpu.memory_space<vmem>>, %arg5: memref<128x128xf32, #tpu.memory_space<vmem>>) attributes {dimension_semantics = [#tpu.dimension_semantics<parallel>], iteration_bounds = array<i64: 4>, scalar_prefetch = 0 : i64, scratch_operands = 0 : i64, tpu.core_type = #tpu.core_type<tc>, window_params = [{transform_indices = @transform_0, window_bounds = array<i64: 128, 128>}, {pipeline_mode = #tpu.pipeline_mode<synchronous>, transform_indices = @transform_1, window_bounds = array<i64: 1, 128>}, {pipeline_mode = #tpu.pipeline_mode<synchronous>, transform_indices = @transform_2, window_bounds = array<i64: 1, 128>}, {transform_indices = @transform_3, window_bounds = array<i64: 128, 128>}, {transform_indices = @transform_4, window_bounds = array<i64: 128, 128>}]} {
    %c0 = arith.constant 0 : index
    %c0_0 = arith.constant 0 : index
    %0 = vector.load %arg1[%c0, %c0_0] : memref<128x128xf32, #tpu.memory_space<vmem>>, vector<128x128xf32>
    %c0_1 = arith.constant 0 : index
    %c0_2 = arith.constant 0 : index
    %1 = vector.load %arg2[%c0_1, %c0_2] : memref<1x128xf32, #tpu.memory_space<vmem>>, vector<1x128xf32>
    %2 = vector.broadcast %1 : vector<1x128xf32> to vector<128x128xf32>
    %3 = arith.mulf %0, %2 : vector<128x128xf32>
    %c0_3 = arith.constant 0 : index
    %c0_4 = arith.constant 0 : index
    %4 = vector.load %arg3[%c0_3, %c0_4] : memref<1x128xf32, #tpu.memory_space<vmem>>, vector<1x128xf32>
    %5 = vector.broadcast %4 : vector<1x128xf32> to vector<128x128xf32>
    %6 = arith.addf %3, %5 : vector<128x128xf32>
    %c0_5 = arith.constant 0 : index
    %c0_6 = arith.constant 0 : index
    %7 = vector.load %arg4[%c0_5, %c0_6] : memref<128x128xf32, #tpu.memory_space<vmem>>, vector<128x128xf32>
    %8 = arith.addf %6, %7 : vector<128x128xf32>
    %cst = arith.constant 0.000000e+00 : f32
    %9 = vector.broadcast %cst : f32 to vector<128x128xf32>
    %10 = arith.maximumf %8, %9 : vector<128x128xf32>
    %c0_7 = arith.constant 0 : index
    %c0_8 = arith.constant 0 : index
    %11 = vector.load %arg5[%c0_7, %c0_8] : memref<128x128xf32, #tpu.memory_space<vmem>>, vector<128x128xf32>
    tpu.vector_store %arg5[%c0_7, %c0_8], %10 {strides = array<i32>} : memref<128x128xf32, #tpu.memory_space<vmem>>, vector<128x128xf32>,
    return
  }
  func.func @transform_0(%arg0: i32) -> (i32, i32) {
    %c0_i32 = arith.constant 0 : i32
    %c0_i32_0 = arith.constant 0 : i32
    return %arg0, %c0_i32 : i32, i32
  }
  func.func @transform_1(%arg0: i32) -> (i32, i32) {
    %c0_i32 = arith.constant 0 : i32
    %c0_i32_0 = arith.constant 0 : i32
    %c0_i32_1 = arith.constant 0 : i32
    return %c0_i32, %c0_i32_0 : i32, i32
  }
  func.func @transform_2(%arg0: i32) -> (i32, i32) {
    %c0_i32 = arith.constant 0 : i32
    %c0_i32_0 = arith.constant 0 : i32
    %c0_i32_1 = arith.constant 0 : i32
    return %c0_i32, %c0_i32_0 : i32, i32
  }
  func.func @transform_3(%arg0: i32) -> (i32, i32) {
    %c0_i32 = arith.constant 0 : i32
    %c0_i32_0 = arith.constant 0 : i32
    return %arg0, %c0_i32 : i32, i32
  }
  func.func @transform_4(%arg0: i32) -> (i32, i32) {
    %c0_i32 = arith.constant 0 : i32
    %c0_i32_0 = arith.constant 0 : i32
    return %arg0, %c0_i32 : i32, i32
  }
}

</mosaic_0001>

<bundles_post_ra>
// kernel: basic_block_forward.5
= control target key start
LH: loop header
LB: loop body
LE: loop exit
PB: predicated region body
PF: predicated region fallthrough
CT: control target
= control target key end

     0   :  { %s516_s12 = smov 0   ;;  %s607_s0 = inlined_call_operand.vmem [shape: f32[512,128], index: 0, kind: input, shape index: {}]   ;;  %s608_s1 = inlined_call_operand.vmem [shape: f32[1,128], index: 1, kind: input, shape index: {}]   ;;  %s609_s2 = inlined_call_operand.vmem [shape: f32[1,128], index: 2, kind: input, shape index: {}]   ;;  %s610_s3 = inlined_call_operand.vmem [shape: bf16[512,128], index: 3, kind: output, shape index: {}]  }
   0x1 LB: > { %s388_s13 = sadd.s32 4294967295, %s494_s12   ;;  %p392_p0 = scmp.ge.s32.totalorder %s494_s12, 1  ;;  %s494_s12 = sphi %s516_s12, %s13_s12  }
   0x2   : > { %p138_p1 = scmp.lt.s32.totalorder %s494_s12, 5 }
   0x4   : > { %p139_p2 = pnand %p392_p0, %p138_p1 }
   0x5   : > { %s393_s14 = sshll.u32 (!%p139_p2), %s388_s13, 4 }
   0x6   : > { %142 = sbr.rel (%p139_p2) target bundleno = 35 (0x23), region = 32  ;;  %p163_p3 = scmp.lt.s32.totalorder (!%p139_p2), %s393_s14, 63 }
   0xb   : > { %s612_s14 = smov (!%p163_p3, %s393_s14), 63  ;;  %v530_v0 = vld [vmem:[%s608_s1] ss:$0 sm:$0xff] }
   0xc   : > { %s394_s15 = sshll.u32 %s612_s14, 3  ;;  %v540_v1 = vld [vmem:[%s609_s2] ss:$0 sm:$0xff]  ;;  %s396_s23 = sshll.u32 %s612_s14, 2 }
   0xd   : > { %s535_s20 = scalar_lea.vmem %s607_s0, %s394_s15  ;;  %s572_s26 = scalar_lea.vmem %s610_s3, %s396_s23 }
   0xe   : > { %v174_v2 = vld [vmem:[%s535_s20] sm:$0xff]  ;;  %v175_v3 = vld [vmem:[%s535_s20 + $0x8] sm:$0xff]  ;;  %v176_v4 = vld [vmem:[%s535_s20 + $0x10] sm:$0xff] }
   0xf   : > { %v197_v5 = vmul.f32 %v530_v0, %v174_v2  ;;  %v198_v6 = vmul.f32 %v530_v0, %v175_v3  ;;  %v177_v7 = vld [vmem:[%s535_s20 + $0x18] sm:$0xff]  ;;  %v199_v8 = vmul.f32 %v530_v0, %v176_v4  ;;  %v178_v9 = vld [vmem:[%s535_s20 + $0x20] sm:$0xff]  ;;  %v179_v10 = vld [vmem:[%s535_s20 + $0x28] sm:$0xff] }
  0x10   : > { %v200_v11 = vmul.f32 %v530_v0, %v177_v7  ;;  %v201_v12 = vmul.f32 %v530_v0, %v178_v9  ;;  %v202_v13 = vmul.f32 %v530_v0, %v179_v10  ;;  %v180_v14 = vld [vmem:[%s535_s20 + $0x30] sm:$0xff]  ;;  %v181_v15 = vld [vmem:[%s535_s20 + $0x38] sm:$0xff]  ;;  %v182_v24 = vld [vmem:[%s535_s20 + $0x40] sm:$0xff] }
  0x11   : > { %v220_v16 = vadd.f32 %v540_v1, %v197_v5  ;;  %v221_v17 = vadd.f32 %v540_v1, %v198_v6  ;;  %v222_v18 = vadd.f32 %v540_v1, %v199_v8  ;;  %v203_v19 = vmul.f32 %v530_v0, %v180_v14  ;;  %v183_v25 = vld [vmem:[%s535_s20 + $0x48] sm:$0xff]  ;;  %v184_v30 = vld [vmem:[%s535_s20 + $0x50] sm:$0xff]  ;;  %v185_v35 = vld [vmem:[%s535_s20 + $0x58] sm:$0xff] }
  0x12   : > { %v223_v20 = vadd.f32 %v540_v1, %v200_v11  ;;  %v224_v21 = vadd.f32 %v540_v1, %v201_v12  ;;  %v225_v22 = vadd.f32 %v540_v1, %v202_v13  ;;  %v204_v23 = vmul.f32 %v530_v0, %v181_v15  ;;  %v186_v36 = vld [vmem:[%s535_s20 + $0x60] sm:$0xff]  ;;  %v187_v41 = vld [vmem:[%s535_s20 + $0x68] sm:$0xff]  ;;  %v188_v42 = vld [vmem:[%s535_s20 + $0x70] sm:$0xff] }
  0x13   : > { %v236_v26 = vmax.f32 %v220_v16, 0.0  ;;  %v237_v27 = vmax.f32 %v221_v17, 0.0  ;;  %v238_v28 = vmax.f32 %v222_v18, 0.0  ;;  %v226_v29 = vadd.f32 %v540_v1, %v203_v19  ;;  %v189_v51 = vld [vmem:[%s535_s20 + $0x78] sm:$0xff] }
  0x14   : > { %v239_v31 = vmax.f32 %v223_v20, 0.0  ;;  %v240_v32 = vmax.f32 %v224_v21, 0.0  ;;  %v241_v33 = vmax.f32 %v225_v22, 0.0  ;;  %v227_v34 = vadd.f32 %v540_v1, %v204_v23 }
  0x15   : > { %v436_v37 = vpack.c.bf16 %v237_v27, %v236_v26  ;;  %v242_v38 = vmax.f32 %v226_v29, 0.0  ;;  %v205_v39 = vmul.f32 %v530_v0, %v182_v24  ;;  %v206_v40 = vmul.f32 %v530_v0, %v183_v25 }
  0x16   : > { %v441_v43 = vpack.c.bf16 %v239_v31, %v238_v28  ;;  %v446_v44 = vpack.c.bf16 %v241_v33, %v240_v32  ;;  %v243_v45 = vmax.f32 %v227_v34, 0.0  ;;  %v207_v46 = vmul.f32 %v530_v0, %v184_v30 }
  0x17   : > { %437 = vst [vmem:[%s572_s26] sm:$0xff] %v436_v37   ;;  %v228_v47 = vadd.f32 %v540_v1, %v205_v39  ;;  %v229_v48 = vadd.f32 %v540_v1, %v206_v40  ;;  %v208_v49 = vmul.f32 %v530_v0, %v185_v35  ;;  %v209_v50 = vmul.f32 %v530_v0, %v186_v36 }
  0x18   : > { %473 = vst [vmem:[%s572_s26 + $0x8] sm:$0xff] %v441_v43   ;;  %474 = vst [vmem:[%s572_s26 + $0x10] sm:$0xff] %v446_v44   ;;  %v451_v52 = vpack.c.bf16 %v243_v45, %v242_v38  ;;  %v230_v53 = vadd.f32 %v540_v1, %v207_v46  ;;  %v210_v54 = vmul.f32 %v530_v0, %v187_v41 }
  0x19   : > { %v211_v55 = vmul.f32 %v530_v0, %v188_v42  ;;  %v244_v56 = vmax.f32 %v228_v47, 0.0  ;;  %v245_v57 = vmax.f32 %v229_v48, 0.0  ;;  %v231_v58 = vadd.f32 %v540_v1, %v208_v49 }
  0x1a   : > { %v232_v59 = vadd.f32 %v540_v1, %v209_v50  ;;  %475 = vst [vmem:[%s572_s26 + $0x18] sm:$0xff] %v451_v52   ;;  %v246_v60 = vmax.f32 %v230_v53, 0.0  ;;  %v233_v61 = vadd.f32 %v540_v1, %v210_v54  ;;  %v212_v62 = vmul.f32 %v530_v0, %v189_v51 }
  0x1b   : > { %v234_v63 = vadd.f32 %v540_v1, %v211_v55  ;;  %v456_v2 = vpack.c.bf16 %v245_v57, %v244_v56  ;;  %v247_v3 = vmax.f32 %v231_v58, 0.0 }
  0x1c   : > { %v248_v4 = vmax.f32 %v232_v59, 0.0  ;;  %v249_v5 = vmax.f32 %v233_v61, 0.0  ;;  %v235_v6 = vadd.f32 %v540_v1, %v212_v62 }
  0x1d   : > { %v250_v7 = vmax.f32 %v234_v63, 0.0  ;;  %476 = vst [vmem:[%s572_s26 + $0x20] sm:$0xff] %v456_v2   ;;  %v461_v8 = vpack.c.bf16 %v247_v3, %v246_v60 }
  0x1e   : > { %v466_v9 = vpack.c.bf16 %v249_v5, %v248_v4  ;;  %v251_v10 = vmax.f32 %v235_v6, 0.0 }
  0x1f   : > { %477 = vst [vmem:[%s572_s26 + $0x28] sm:$0xff] %v461_v8  }
  0x20   : > { %478 = vst [vmem:[%s572_s26 + $0x30] sm:$0xff] %v466_v9   ;;  %v471_v11 = vpack.c.bf16 %v251_v10, %v250_v7 }
  0x22   : > { %479 = vst [vmem:[%s572_s26 + $0x38] sm:$0xff] %v471_v11  }
  0x23 PF: > { %s13_s12 = sadd.s32 1, %s494_s12  }
  0x24   : > { %p10_p4 = scmp.ge.s32.totalorder %s13_s12, 6  }
  0x26   :  { %12 = sbr.rel (!%p10_p4) target bundleno = 1 (0x1), region = 62 }

// kernel: basic_block_forward.4
= control target key start
LH: loop header
LB: loop body
LE: loop exit
PB: predicated region body
PF: predicated region fallthrough
CT: control target
= control target key end

     0   :  { %s718_s12 = smov 0   ;;  %s799_s0 = inlined_call_operand.vmem [shape: bf16[512,128], index: 0, kind: input, shape index: {}]   ;;  %s800_s1 = inlined_call_operand.vmem [shape: bf16[128,128], index: 1, kind: input, shape index: {}]   ;;  %s801_s2 = inlined_call_operand.vmem [shape: f32[512,128], index: 2, kind: output, shape index: {0}]   ;;  %s802_s3 = inlined_call_operand.vmem [shape: f32[4,2,128], index: 3, kind: output, shape index: {1}]  }
   0x1 LB: > { %s724_s13 = sadd.s32 4294967295, %s696_s12   ;;  %p578_p0 = scmp.ge.s32.totalorder %s696_s12, 1  ;;  %s696_s12 = sphi %s718_s12, %s14_s12  }
   0x2   : > { %p141_p1 = scmp.lt.s32.totalorder %s696_s12, 5 }
   0x4   : > { %p142_p2 = pnand %p578_p0, %p141_p1 }
   0x5   : > { %s579_s16 = sshll.u32 (!%p142_p2), %s724_s13, 4  ;;  %p181_p4 = scmp.lt.s32.totalorder (!%p142_p2), %s724_s13, 3 }
   0x6   : > { %145 = sbr.rel (%p142_p2) target bundleno = 288 (0x120), region = 28  ;;  %p170_p3 = scmp.lt.s32.totalorder (!%p142_p2), %s579_s16, 63 }
   0xb   : > { %v674_v0 = vld [vmem:[%s800_s1 + $0x38] sm:$0xff]   ;;  %v675_v1 = vld [vmem:[%s800_s1 + $0x30] sm:$0xff]   ;;  %s804_s16 = smov (!%p170_p3, %s579_s16), 63  ;;  %v676_v2 = vld [vmem:[%s800_s1 + $0x28] sm:$0xff]   ;;  %s806_s13 = smov (!%p181_p4, %s724_s13), 3 }
   0xc   : > { %618 = vmatprep.subr.bf16.mxu0 %v674_v0  ;;  %650 = vmatprep.subr.bf16.mxu1 %v674_v0  ;;  %s580_s21 = sshll.u32 %s804_s16, 2  ;;  %v677_v3 = vld [vmem:[%s800_s1 + $0x20] sm:$0xff]   ;;  %v678_v5 = vld [vmem:[%s800_s1 + $0x18] sm:$0xff]   ;;  %v679_v7 = vld [vmem:[%s800_s1 + $0x10] sm:$0xff]   ;;  %s582_s8 = sshll.u32 %s804_s16, 3 }
   0xd   : > { %619 = vmatpush3.bf16.msra.mxu0 %v674_v0  ;;  %658 = vmatpush3.bf16.msra.mxu1 %v674_v0  ;;  %s744_s24 = scalar_lea.vmem %s799_s0, %s580_s21  ;;  %v680_v8 = vld [vmem:[%s800_s1 + $0x8] sm:$0xff]   ;;  %v681_v9 = vld [vmem:[%s800_s1] sm:$0xff]   ;;  %s773_s11 = scalar_lea.vmem %s801_s2, %s582_s8 }
   0xe   : > { %620 = vmatprep.subr.bf16.mxu0 %v675_v1  ;;  %651 = vmatprep.subr.bf16.mxu1 %v675_v1  ;;  %v682_v4 = vld [vmem:[%s744_s24] sm:$0xff]   ;;  %v683_v10 = vld [vmem:[%s744_s24 + $0x8] sm:$0xff]   ;;  %v684_v12 = vld [vmem:[%s744_s24 + $0x10] sm:$0xff]   ;;  %s583_s14 = sshll.u32 %s806_s13, 1 }
   0xf   : > { %634 = vmatprep.mubr.bf16.mxu0 %v682_v4  ;;  %v686_v6 = vld [vmem:[%s744_s24 + $0x20] sm:$0xff]   ;;  %v687_v11 = vld [vmem:[%s744_s24 + $0x28] sm:$0xff]   ;;  %v688_v13 = vld [vmem:[%s744_s24 + $0x30] sm:$0xff]   ;;  %s184_s17 = scalar_lea.vmem %s802_s3, %s583_s14 }
  0x10   : > { %642 = vmatprep.mubr.bf16.mxu1 %v686_v6  ;;  %v685_v14 = vld [vmem:[%s744_s24 + $0x18] sm:$0xff]  }
  0x11   : > { %621 = vmatpush3.bf16.msra.mxu0 %v675_v1  ;;  %659 = vmatpush3.bf16.msra.mxu1 %v675_v1  ;;  %v689_v15 = vld [vmem:[%s744_s24 + $0x38] sm:$0xff]  }
  0x12   : > { %622 = vmatprep.subr.bf16.mxu0 %v676_v2  ;;  %652 = vmatprep.subr.bf16.mxu1 %v676_v2 }
  0x15   : > { %623 = vmatpush3.bf16.msra.mxu0 %v676_v2  ;;  %660 = vmatpush3.bf16.msra.mxu1 %v676_v2 }
  0x16   : > { %624 = vmatprep.subr.bf16.mxu0 %v677_v3  ;;  %653 = vmatprep.subr.bf16.mxu1 %v677_v3 }
  0x19   : > { %625 = vmatpush3.bf16.msra.mxu0 %v677_v3  ;;  %661 = vmatpush3.bf16.msra.mxu1 %v677_v3 }
  0x1a   : > { %626 = vmatprep.subr.bf16.mxu0 %v678_v5  ;;  %654 = vmatprep.subr.bf16.mxu1 %v678_v5 }
  0x1d   : > { %627 = vmatpush3.bf16.msra.mxu0 %v678_v5  ;;  %662 = vmatpush3.bf16.msra.mxu1 %v678_v5 }
  0x1e   : > { %628 = vmatprep.subr.bf16.mxu0 %v679_v7  ;;  %655 = vmatprep.subr.bf16.mxu1 %v679_v7 }
  0x21   : > { %629 = vmatpush3.bf16.msra.mxu0 %v679_v7  ;;  %663 = vmatpush3.bf16.msra.mxu1 %v679_v7 }
  0x22   : > { %630 = vmatprep.subr.bf16.mxu0 %v680_v8  ;;  %656 = vmatprep.subr.bf16.mxu1 %v680_v8 }
  0x25   : > { %631 = vmatpush3.bf16.msra.mxu0 %v680_v8  ;;  %664 = vmatpush3.bf16.msra.mxu1 %v680_v8 }
  0x26   : > { %632 = vmatprep.subr.bf16.mxu0 %v681_v9  ;;  %657 = vmatprep.subr.bf16.mxu1 %v681_v9 }
  0x29   : > { %633 = vmatpush3.bf16.msra.mxu0 %v681_v9  ;;  %665 = vmatpush3.bf16.msra.mxu1 %v681_v9 }
  0x2c   : > { %635 = vmatmul.mubr.bf16.vlgmr.msra.gmra.mxu0 %v683_v10  ;;  %643 = vmatmul.mubr.bf16.vlgmr.msra.gmra.mxu1 %v687_v11 }
  0x2d   : > { %638 = vmatprep.mubr.bf16.mxu0 %v684_v12  ;;  %646 = vmatprep.mubr.bf16.mxu1 %v688_v13 }
  0x34   : > { %639 = vmatmul.mubr.bf16.gmra.mxu0 %v685_v14  ;;  %647 = vmatmul.mubr.bf16.gmra.mxu1 %v689_v15 }
  0xec   : > { %v636_v16 = vpop.f32.mrf.mxu0  ;;  %v644_v17 = vpop.f32.mrf.mxu1 }
  0xed   : > { %413 = vst [vmem:[%s773_s11 + $0x10] sm:$0xff] %v636_v16  ;;  %421 = vst [vmem:[%s773_s11 + $0x50] sm:$0xff] %v644_v17  ;;  %v451_v29 = vmul.f32 %v636_v16, %v636_v16  ;;  %v459_v59 = vmul.f32 %v644_v17, %v644_v17 }
  0xee   : > { %v348_v18 = vpop.f32.mrf.mxu0  ;;  %v380_v19 = vpop.f32.mrf.mxu1 }
  0xef   : > { %411 = vst [vmem:[%s773_s11] sm:$0xff] %v348_v18  ;;  %419 = vst [vmem:[%s773_s11 + $0x40] sm:$0xff] %v380_v19  ;;  %v449_v24 = vmul.f32 %v348_v18, %v348_v18  ;;  %v457_v53 = vmul.f32 %v380_v19, %v380_v19 }
  0xf0   : > { %v637_v20 = vpop.f32.mrf.mxu0  ;;  %v645_v21 = vpop.f32.mrf.mxu1 }
  0xf1   : > { %414 = vst [vmem:[%s773_s11 + $0x18] sm:$0xff] %v637_v20  ;;  %422 = vst [vmem:[%s773_s11 + $0x58] sm:$0xff] %v645_v21  ;;  %v452_v34 = vmul.f32 %v637_v20, %v637_v20  ;;  %v460_v62 = vmul.f32 %v645_v21, %v645_v21 }
  0xf2   : > { %v351_v22 = vpop.f32.mrf.mxu0  ;;  %v383_v23 = vpop.f32.mrf.mxu1 }
  0xf3   : > { %412 = vst [vmem:[%s773_s11 + $0x8] sm:$0xff] %v351_v22  ;;  %v427_v25 = vadd.f32 %v351_v22, %v348_v18  ;;  %v450_v26 = vmul.f32 %v351_v22, %v351_v22  ;;  %420 = vst [vmem:[%s773_s11 + $0x48] sm:$0xff] %v383_v23  ;;  %v458_v57 = vmul.f32 %v383_v23, %v383_v23 }
  0xf4   : > { %v640_v27 = vpop.f32.mrf.mxu0  ;;  %v648_v28 = vpop.f32.mrf.mxu1 }
  0xf5   : > { %v428_v30 = vadd.f32 %v636_v16, %v427_v25  ;;  %v465_v31 = vadd.f32 %v450_v26, %v449_v24  ;;  %417 = vst [vmem:[%s773_s11 + $0x30] sm:$0xff] %v640_v27  ;;  %425 = vst [vmem:[%s773_s11 + $0x70] sm:$0xff] %v648_v28  ;;  %v455_v47 = vmul.f32 %v640_v27, %v640_v27 }
  0xf6   : > { %v364_v32 = vpop.f32.mrf.mxu0  ;;  %v396_v33 = vpop.f32.mrf.mxu1  ;;  %v463_v7 = vmul.f32 %v648_v28, %v648_v28 }
  0xf7   : > { %v466_v35 = vadd.f32 %v465_v31, %v451_v29  ;;  %415 = vst [vmem:[%s773_s11 + $0x20] sm:$0xff] %v364_v32  ;;  %v429_v36 = vadd.f32 %v637_v20, %v428_v30  ;;  %423 = vst [vmem:[%s773_s11 + $0x60] sm:$0xff] %v396_v33  ;;  %v453_v40 = vmul.f32 %v364_v32, %v364_v32 }
  0xf8   : > { %v641_v37 = vpop.f32.mrf.mxu0  ;;  %v649_v38 = vpop.f32.mrf.mxu1  ;;  %v461_v2 = vmul.f32 %v396_v33, %v396_v33 }
  0xf9   : > { %v430_v39 = vadd.f32 %v429_v36, %v364_v32  ;;  %v467_v41 = vadd.f32 %v466_v35, %v452_v34  ;;  %418 = vst [vmem:[%s773_s11 + $0x38] sm:$0xff] %v641_v37  ;;  %426 = vst [vmem:[%s773_s11 + $0x78] sm:$0xff] %v649_v38  ;;  %v456_v50 = vmul.f32 %v641_v37, %v641_v37 }
  0xfa   : > { %v367_v42 = vpop.f32.mrf.mxu0  ;;  %v399_v43 = vpop.f32.mrf.mxu1  ;;  %v464_v10 = vmul.f32 %v649_v38, %v649_v38 }
  0xfb   : > { %v468_v44 = vadd.f32 %v467_v41, %v453_v40  ;;  %416 = vst [vmem:[%s773_s11 + $0x28] sm:$0xff] %v367_v42  ;;  %v431_v45 = vadd.f32 %v430_v39, %v367_v42  ;;  %v454_v46 = vmul.f32 %v367_v42, %v367_v42  ;;  %424 = vst [vmem:[%s773_s11 + $0x68] sm:$0xff] %v399_v43 }
  0xfc   : > { %v462_v6 = vmul.f32 %v399_v43, %v399_v43 }
  0xfd   : > { %v432_v48 = vadd.f32 %v640_v27, %v431_v45  ;;  %v469_v49 = vadd.f32 %v468_v44, %v454_v46 }
  0xff   : > { %v433_v51 = vadd.f32 %v641_v37, %v432_v48  ;;  %v470_v52 = vadd.f32 %v469_v49, %v455_v47 }
 0x101   : > { %v471_v54 = vadd.f32 %v470_v52, %v456_v50  ;;  %v434_v55 = vadd.f32 %v433_v51, %v380_v19 }
 0x103   : > { %v435_v56 = vadd.f32 %v434_v55, %v383_v23  ;;  %v472_v58 = vadd.f32 %v471_v54, %v457_v53 }
 0x105   : > { %v436_v60 = vadd.f32 %v644_v17, %v435_v56  ;;  %v473_v61 = vadd.f32 %v472_v58, %v458_v57 }
 0x107   : > { %v474_v63 = vadd.f32 %v473_v61, %v459_v59  ;;  %v437_v0 = vadd.f32 %v645_v21, %v436_v60 }
 0x109   : > { %v438_v1 = vadd.f32 %v437_v0, %v396_v33  ;;  %v475_v3 = vadd.f32 %v474_v63, %v460_v62 }
 0x10b   : > { %v476_v4 = vadd.f32 %v475_v3, %v461_v2  ;;  %v439_v5 = vadd.f32 %v438_v1, %v399_v43 }
 0x10d   : > { %v440_v8 = vadd.f32 %v648_v28, %v439_v5  ;;  %v477_v9 = vadd.f32 %v476_v4, %v462_v6 }
 0x10f   : > { %v441_v11 = vadd.f32 %v649_v38, %v440_v8  ;;  %v478_v12 = vadd.f32 %v477_v9, %v463_v7 }
 0x111   : > { %v442_v13 = vrot.slane %v441_v11, 4  ;;  %v479_v14 = vadd.f32 %v478_v12, %v464_v10 }
 0x113   : > { %v443_v15 = vadd.f32 %v442_v13, %v441_v11  ;;  %v480_v16 = vrot.slane %v479_v14, 4 }
 0x115   : > { %v444_v17 = vrot.slane %v443_v15, 2  ;;  %v481_v18 = vadd.f32 %v480_v16, %v479_v14 }
 0x117   : > { %v445_v19 = vadd.f32 %v444_v17, %v443_v15  ;;  %v482_v20 = vrot.slane %v481_v18, 2 }
 0x119   : > { %v446_v21 = vrot.slane %v445_v19, 1  ;;  %v483_v22 = vadd.f32 %v482_v20, %v481_v18 }
 0x11b   : > { %v447_v23 = vadd.f32 %v446_v21, %v445_v19  ;;  %v484_v24 = vrot.slane %v483_v22, 1 }
 0x11d   : > { %448 = vst [vmem:[%s184_s17] sm:$0x1] %v447_v23  ;;  %v485_v25 = vadd.f32 %v484_v24, %v483_v22 }
 0x11f   : > { %486 = vst [vmem:[%s184_s17 + $0x1] sm:$0x1] %v485_v25 }
 0x120 PF: > { %s14_s12 = sadd.s32 1, %s696_s12  }
 0x121   : > { %p11_p5 = scmp.ge.s32.totalorder %s14_s12, 6  }
 0x123   :  { %13 = sbr.rel (!%p11_p5) target bundleno = 1 (0x1), region = 70 }

// kernel: basic_block_forward.7
= control target key start
LH: loop header
LB: loop body
LE: loop exit
PB: predicated region body
PF: predicated region fallthrough
CT: control target
= control target key end

     0   :  { %s473_s15 = smov 0   ;;  %s594_s0 = inlined_call_operand.vmem [shape: f32[512,128], index: 0, kind: input, shape index: {}]   ;;  %s595_s1 = inlined_call_operand.vmem [shape: f32[1,128], index: 1, kind: input, shape index: {}]   ;;  %s596_s2 = inlined_call_operand.vmem [shape: f32[1,128], index: 2, kind: input, shape index: {}]   ;;  %s597_s3 = inlined_call_operand.vmem [shape: f32[512,128], index: 3, kind: input, shape index: {}]   ;;  %s598_s4 = inlined_call_operand.vmem [shape: f32[512,128], index: 4, kind: output, shape index: {}]  }
   0x1 LB: > { %s417_s16 = sadd.s32 4294967295, %s446_s15   ;;  %p421_p0 = scmp.ge.s32.totalorder %s446_s15, 1  ;;  %s446_s15 = sphi %s473_s15, %s14_s15  }
   0x2   : > { %p174_p1 = scmp.lt.s32.totalorder %s446_s15, 5 }
   0x4   : > { %p175_p2 = pnand %p421_p0, %p174_p1 }
   0x5   : > { %s422_s17 = sshll.u32 (!%p175_p2), %s417_s16, 4 }
   0x6   : > { %178 = sbr.rel (%p175_p2) target bundleno = 37 (0x25), region = 36  ;;  %p206_p3 = scmp.lt.s32.totalorder (!%p175_p2), %s422_s17, 63 }
   0xb   : > { %s600_s17 = smov (!%p206_p3, %s422_s17), 63  ;;  %v486_v0 = vld [vmem:[%s595_s1] ss:$0 sm:$0xff] }
   0xc   : > { %s481_s18 = sshll.u32 %s600_s17, 3  ;;  %v504_v2 = vld [vmem:[%s596_s2] ss:$0 sm:$0xff] }
   0xd   : > { %s492_s23 = scalar_lea.vmem %s594_s0, %s481_s18  ;;  %s498_s26 = scalar_lea.vmem %s597_s3, %s481_s18 }
   0xe   : > { %v223_v1 = vld [vmem:[%s492_s23] sm:$0xff]  ;;  %v224_v3 = vld [vmem:[%s492_s23 + $0x8] sm:$0xff]  ;;  %v225_v7 = vld [vmem:[%s492_s23 + $0x10] sm:$0xff]  ;;  %s534_s5 = scalar_lea.vmem %s598_s4, %s481_s18 }
   0xf   : > { %v246_v4 = vmul.f32 %v486_v0, %v223_v1  ;;  %v285_v5 = vld [vmem:[%s498_s26] sm:$0xff]  ;;  %v247_v6 = vmul.f32 %v486_v0, %v224_v3  ;;  %v286_v8 = vld [vmem:[%s498_s26 + $0x8] sm:$0xff]  ;;  %v248_v9 = vmul.f32 %v486_v0, %v225_v7  ;;  %v226_v10 = vld [vmem:[%s492_s23 + $0x18] sm:$0xff] }
  0x10   : > { %v227_v11 = vld [vmem:[%s492_s23 + $0x20] sm:$0xff]  ;;  %v287_v14 = vld [vmem:[%s498_s26 + $0x10] sm:$0xff]  ;;  %v249_v15 = vmul.f32 %v486_v0, %v226_v10  ;;  %v288_v16 = vld [vmem:[%s498_s26 + $0x18] sm:$0xff] }
  0x11   : > { %v269_v12 = vadd.f32 %v504_v2, %v246_v4  ;;  %v270_v13 = vadd.f32 %v504_v2, %v247_v6  ;;  %v250_v17 = vmul.f32 %v486_v0, %v227_v11  ;;  %v228_v18 = vld [vmem:[%s492_s23 + $0x28] sm:$0xff]  ;;  %v271_v19 = vadd.f32 %v504_v2, %v248_v9  ;;  %v289_v20 = vld [vmem:[%s498_s26 + $0x20] sm:$0xff]  ;;  %v229_v22 = vld [vmem:[%s492_s23 + $0x30] sm:$0xff] }
  0x12   : > { %v251_v21 = vmul.f32 %v486_v0, %v228_v18  ;;  %v230_v23 = vld [vmem:[%s492_s23 + $0x38] sm:$0xff]  ;;  %v272_v26 = vadd.f32 %v504_v2, %v249_v15  ;;  %v290_v28 = vld [vmem:[%s498_s26 + $0x28] sm:$0xff]  ;;  %v252_v31 = vmul.f32 %v486_v0, %v229_v22  ;;  %v231_v33 = vld [vmem:[%s492_s23 + $0x40] sm:$0xff] }
  0x13   : > { %v301_v24 = vadd.f32 %v285_v5, %v269_v12  ;;  %v302_v25 = vadd.f32 %v286_v8, %v270_v13  ;;  %v273_v27 = vadd.f32 %v504_v2, %v250_v17  ;;  %v303_v29 = vadd.f32 %v287_v14, %v271_v19  ;;  %v232_v34 = vld [vmem:[%s492_s23 + $0x48] sm:$0xff]  ;;  %v291_v39 = vld [vmem:[%s498_s26 + $0x30] sm:$0xff]  ;;  %v292_v40 = vld [vmem:[%s498_s26 + $0x38] sm:$0xff] }
  0x14   : > { %v274_v30 = vadd.f32 %v504_v2, %v251_v21  ;;  %v253_v32 = vmul.f32 %v486_v0, %v230_v23  ;;  %v304_v37 = vadd.f32 %v288_v16, %v272_v26  ;;  %v233_v41 = vld [vmem:[%s492_s23 + $0x50] sm:$0xff]  ;;  %v275_v44 = vadd.f32 %v504_v2, %v252_v31  ;;  %v234_v46 = vld [vmem:[%s492_s23 + $0x58] sm:$0xff]  ;;  %v235_v47 = vld [vmem:[%s492_s23 + $0x60] sm:$0xff] }
  0x15   : > { %v317_v35 = vmax.f32 %v301_v24, 0.0  ;;  %v318_v36 = vmax.f32 %v302_v25, 0.0  ;;  %v305_v38 = vadd.f32 %v289_v20, %v273_v27  ;;  %v319_v42 = vmax.f32 %v303_v29, 0.0  ;;  %v236_v52 = vld [vmem:[%s492_s23 + $0x68] sm:$0xff]  ;;  %v293_v56 = vld [vmem:[%s498_s26 + $0x40] sm:$0xff]  ;;  %v295_v61 = vld [vmem:[%s498_s26 + $0x50] sm:$0xff] }
  0x16   : > { %v306_v43 = vadd.f32 %v290_v28, %v274_v30  ;;  %v276_v45 = vadd.f32 %v504_v2, %v253_v32  ;;  %v320_v48 = vmax.f32 %v304_v37, 0.0  ;;  %v254_v50 = vmul.f32 %v486_v0, %v231_v33  ;;  %v294_v57 = vld [vmem:[%s498_s26 + $0x48] sm:$0xff]  ;;  %v237_v1 = vld [vmem:[%s492_s23 + $0x70] sm:$0xff]  ;;  %v238_v3 = vld [vmem:[%s492_s23 + $0x78] sm:$0xff] }
  0x17   : > { %333 = vst [vmem:[%s534_s5] sm:$0xff] %v317_v35  ;;  %334 = vst [vmem:[%s534_s5 + $0x8] sm:$0xff] %v318_v36  ;;  %v321_v49 = vmax.f32 %v305_v38, 0.0  ;;  %v255_v51 = vmul.f32 %v486_v0, %v232_v34  ;;  %v307_v54 = vadd.f32 %v291_v39, %v275_v44  ;;  %v256_v58 = vmul.f32 %v486_v0, %v233_v41  ;;  %v296_v7 = vld [vmem:[%s498_s26 + $0x58] sm:$0xff]  ;;  %v297_v8 = vld [vmem:[%s498_s26 + $0x60] sm:$0xff] }
  0x18   : > { %335 = vst [vmem:[%s534_s5 + $0x10] sm:$0xff] %v319_v42  ;;  %v322_v53 = vmax.f32 %v306_v43, 0.0  ;;  %v308_v55 = vadd.f32 %v292_v40, %v276_v45  ;;  %336 = vst [vmem:[%s534_s5 + $0x18] sm:$0xff] %v320_v48  ;;  %v277_v59 = vadd.f32 %v504_v2, %v254_v50  ;;  %v257_v62 = vmul.f32 %v486_v0, %v234_v46  ;;  %v298_v14 = vld [vmem:[%s498_s26 + $0x68] sm:$0xff]  ;;  %v299_v23 = vld [vmem:[%s498_s26 + $0x70] sm:$0xff] }
  0x19   : > { %337 = vst [vmem:[%s534_s5 + $0x20] sm:$0xff] %v321_v49  ;;  %v278_v60 = vadd.f32 %v504_v2, %v255_v51  ;;  %v258_v63 = vmul.f32 %v486_v0, %v235_v47  ;;  %v323_v4 = vmax.f32 %v307_v54, 0.0  ;;  %v279_v6 = vadd.f32 %v504_v2, %v256_v58  ;;  %v300_v24 = vld [vmem:[%s498_s26 + $0x78] sm:$0xff] }
  0x1a   : > { %338 = vst [vmem:[%s534_s5 + $0x28] sm:$0xff] %v322_v53  ;;  %v324_v5 = vmax.f32 %v308_v55, 0.0  ;;  %v259_v9 = vmul.f32 %v486_v0, %v236_v52  ;;  %v309_v10 = vadd.f32 %v293_v56, %v277_v59  ;;  %v280_v12 = vadd.f32 %v504_v2, %v257_v62 }
  0x1b   : > { %v310_v11 = vadd.f32 %v294_v57, %v278_v60  ;;  %v281_v13 = vadd.f32 %v504_v2, %v258_v63  ;;  %339 = vst [vmem:[%s534_s5 + $0x30] sm:$0xff] %v323_v4  ;;  %v311_v15 = vadd.f32 %v295_v61, %v279_v6  ;;  %v260_v17 = vmul.f32 %v486_v0, %v237_v1 }
  0x1c   : > { %340 = vst [vmem:[%s534_s5 + $0x38] sm:$0xff] %v324_v5  ;;  %v282_v16 = vadd.f32 %v504_v2, %v259_v9  ;;  %v261_v18 = vmul.f32 %v486_v0, %v238_v3  ;;  %v325_v19 = vmax.f32 %v309_v10, 0.0  ;;  %v312_v21 = vadd.f32 %v296_v7, %v280_v12 }
  0x1d   : > { %v326_v20 = vmax.f32 %v310_v11, 0.0  ;;  %v313_v22 = vadd.f32 %v297_v8, %v281_v13  ;;  %v327_v25 = vmax.f32 %v311_v15, 0.0  ;;  %v283_v27 = vadd.f32 %v504_v2, %v260_v17 }
  0x1e   : > { %v314_v26 = vadd.f32 %v298_v14, %v282_v16  ;;  %v284_v28 = vadd.f32 %v504_v2, %v261_v18  ;;  %341 = vst [vmem:[%s534_s5 + $0x40] sm:$0xff] %v325_v19  ;;  %v328_v0 = vmax.f32 %v312_v21, 0.0 }
  0x1f   : > { %342 = vst [vmem:[%s534_s5 + $0x48] sm:$0xff] %v326_v20  ;;  %v329_v29 = vmax.f32 %v313_v22, 0.0  ;;  %343 = vst [vmem:[%s534_s5 + $0x50] sm:$0xff] %v327_v25  ;;  %v315_v31 = vadd.f32 %v299_v23, %v283_v27 }
  0x20   : > { %v330_v30 = vmax.f32 %v314_v26, 0.0  ;;  %v316_v32 = vadd.f32 %v300_v24, %v284_v28  ;;  %344 = vst [vmem:[%s534_s5 + $0x58] sm:$0xff] %v328_v0 }
  0x21   : > { %345 = vst [vmem:[%s534_s5 + $0x60] sm:$0xff] %v329_v29  ;;  %v331_v33 = vmax.f32 %v315_v31, 0.0 }
  0x22   : > { %346 = vst [vmem:[%s534_s5 + $0x68] sm:$0xff] %v330_v30  ;;  %v332_v34 = vmax.f32 %v316_v32, 0.0 }
  0x23   : > { %347 = vst [vmem:[%s534_s5 + $0x70] sm:$0xff] %v331_v33 }
  0x24   : > { %348 = vst [vmem:[%s534_s5 + $0x78] sm:$0xff] %v332_v34 }
  0x25 PF: > { %s14_s15 = sadd.s32 1, %s446_s15  }
  0x26   : > { %p11_p4 = scmp.ge.s32.totalorder %s14_s15, 6  }
  0x28   :  { %13 = sbr.rel (!%p11_p4) target bundleno = 1 (0x1), region = 69 }

</bundles_post_ra>
